<compile_context>
chip_gen: v7x
topology: tpu7x:2x2x1
jax: 0.10.0
libtpu: 0.0.40
codegen_flags: <defaults>
</compile_context>

<pallas_src>
import functools

import jax
import jax.numpy as jnp
from jax.experimental import pallas as pl
from jax.experimental.pallas import tpu as pltpu


_MAX_TILE_N = 8192        # row-tile cap (amortizes ~0.35us/step overhead on small C)
_MIN_GRID = 4             # keep >=4 grid steps: v7x megacore sharding + DMA overlap
_OUT_SUBLANES = 8
_OUT_LANES = 128


def _round_up(x, m):
    return ((x + m - 1) // m) * m


def _vmem_budget():
    """Per-generation VMEM sizing derived from hardware, with headroom."""
    cap = None
    try:
        cap = getattr(pltpu.get_tpu_info(), "vmem_capacity_bytes", None)
    except Exception:
        cap = None
    if not cap:
        cap = 64 * 1024 * 1024                                  # conservative (v7x per-TC)
    limit = max(32 * 1024 * 1024, cap - 16 * 1024 * 1024)       # scoped VMEM limit
    budget = max(24 * 1024 * 1024, limit - 8 * 1024 * 1024)     # double-buffered inputs
    return limit, budget


def _pick_tile_n(n, c, itemsize, budget, row_align):
    # 2 inputs x 2 pipeline buffers x (tile_n, C) must fit the input budget.
    bytes_per_row = 2 * 2 * c * itemsize
    tile_n = budget // max(bytes_per_row, 1)
    tile_n = max(row_align, min(_MAX_TILE_N, (tile_n // row_align) * row_align))
    # don't pad far past N for small problems
    tile_n = min(tile_n, _round_up(n, row_align))
    # keep the grid multi-step when N is big enough (v7x megacore + pipelining)
    if n > _MIN_GRID * row_align:
        tile_n = min(tile_n, _round_up(-(-n // _MIN_GRID), row_align))
    return max(row_align, tile_n)


def _row_losses(x_ref, t_ref, n_rows):
    """Per-sample soft cross entropy for one (tile_n, C) row block -> (tile_n, 1)."""
    x = x_ref[...].astype(jnp.float32)
    t = t_ref[...].astype(jnp.float32)

    # numerically-stable log-sum-exp over the class (lane) axis
    m = jnp.max(x, axis=1, keepdims=True)                               # XLU
    shifted = x - m                                                     # VPU
    lse = jnp.log(jnp.sum(jnp.exp(shifted), axis=1, keepdims=True))     # EUP + XLU

    # loss_row = sum_c t_c * (lse - shifted_c) = lse*sum(t) - sum(t*shifted)
    # Fused: the full (tile_n, C) neg_log_softmax is never materialized.
    t_sum = jnp.sum(t, axis=1, keepdims=True)
    t_dot = jnp.sum(t * shifted, axis=1, keepdims=True)
    loss = lse * t_sum - t_dot                                          # (tile_n, 1)

    # Ragged N: rows of the final partial tile beyond N hold unspecified data;
    # mask them explicitly.  Statically skipped when N % tile_n == 0.
    tile_n = x_ref.shape[0]
    if n_rows % tile_n != 0:
        row = pl.program_id(0) * tile_n + jax.lax.broadcasted_iota(
            jnp.int32, loss.shape, 0)
        loss = jnp.where(row < n_rows, loss, 0.0)
    return loss


def _per_sample_kernel(x_ref, t_ref, out_ref, *, n_rows):
    # Narrow (tile_n, 1) column store: output HBM traffic is ~4*N bytes,
    # negligible next to the two (tile_n, C) input reads.
    out_ref[...] = _row_losses(x_ref, t_ref, n_rows).astype(out_ref.dtype)


def _partial_sum_kernel(x_ref, t_ref, out_ref, *, n_rows):
    # reduce=True: one tiny (1, 8, 128) partial-sum block per grid step; the
    # per-sample vector never touches HBM.  Row axis stays "parallel".
    loss = _row_losses(x_ref, t_ref, n_rows)
    partial = jnp.sum(loss, axis=0, keepdims=True)                      # (1, 1)
    out_ref[...] = jnp.broadcast_to(partial.reshape(1, 1, 1), out_ref.shape)


def soft_cross_entropy(inputs, targets, reduce=True, tile_n=None):
    """Pallas equivalent of softCrossEntropy.forward."""
    N, C = inputs.shape
    assert targets.shape == (N, C)

    limit, budget = _vmem_budget()
    itemsize = max(jnp.dtype(inputs.dtype).itemsize,
                   jnp.dtype(targets.dtype).itemsize)
    row_align = max(8, 32 // itemsize)   # 8 for f32, 16 for bf16 sublane packing

    if 2 * 2 * row_align * C * itemsize > budget:
        # TODO(synk): add a class-axis (two-pass LSE) tiling path for huge C.
        raise ValueError(
            f"class dim C={C} too large for the single-block soft-CE kernel")

    if tile_n is None:
        tile_n = _pick_tile_n(N, C, itemsize, budget, row_align)
    assert tile_n % row_align == 0
    num_tiles = -(-N // tile_n)          # ragged last tile handled in-kernel

    in_specs = [
        pl.BlockSpec((tile_n, C), lambda i: (i, 0)),
        pl.BlockSpec((tile_n, C), lambda i: (i, 0)),
    ]
    compiler_params = pltpu.CompilerParams(
        dimension_semantics=("parallel",),   # megacore-shard rows on v7x
        vmem_limit_bytes=limit,
    )

    if reduce:
        partials = pl.pallas_call(
            functools.partial(_partial_sum_kernel, n_rows=N),
            out_shape=jax.ShapeDtypeStruct(
                (num_tiles, _OUT_SUBLANES, _OUT_LANES), jnp.float32),
            grid_spec=pltpu.PrefetchScalarGridSpec(
                num_scalar_prefetch=0,
                grid=(num_tiles,),
                in_specs=in_specs,
                out_specs=pl.BlockSpec(
                    (1, _OUT_SUBLANES, _OUT_LANES), lambda i: (i, 0, 0)),
            ),
            compiler_params=compiler_params,
        )(inputs, targets)
        # torch.sum(log_likelihood * targets) / sample_num
        return jnp.sum(partials[:, 0, 0]) / N

    per_sample = pl.pallas_call(
        functools.partial(_per_sample_kernel, n_rows=N),
        out_shape=jax.ShapeDtypeStruct((N, 1), jnp.float32),
        grid_spec=pltpu.PrefetchScalarGridSpec(
            num_scalar_prefetch=0,
            grid=(num_tiles,),
            in_specs=in_specs,
            out_specs=pl.BlockSpec((tile_n, 1), lambda i: (i, 0)),
        ),
        compiler_params=compiler_params,
    )(inputs, targets)
    return per_sample[:, 0]


def _reference(inputs, targets, reduce):
    ll = -jax.nn.log_softmax(inputs, axis=1)
    if reduce:
        return jnp.sum(ll * targets) / inputs.shape[0]
    return jnp.sum(ll * targets, axis=1)


if __name__ == "__main__":
    key = jax.random.PRNGKey(0)
    k1, k2, k3, k4 = jax.random.split(key, 4)

    # Case 1: small, tile-aligned shapes (8 samples, 32 classes)
    N1, C1 = 8, 32
    x1 = jax.random.normal(k1, (N1, C1), dtype=jnp.float32)
    t1 = jax.nn.softmax(jax.random.normal(k2, (N1, C1), dtype=jnp.float32), axis=1)

    got_red = jax.block_until_ready(soft_cross_entropy(x1, t1, reduce=True))
    got_vec = jax.block_until_ready(soft_cross_entropy(x1, t1, reduce=False))
    assert got_vec.shape == (N1,)
    assert jnp.allclose(got_vec, _reference(x1, t1, False), atol=1e-5, rtol=1e-5)
    assert jnp.allclose(got_red, _reference(x1, t1, True), atol=1e-5, rtol=1e-5)

    # Case 2: ragged row count + non-power-of-two class count
    # (exercises the partial-tile in-kernel mask and the multi-tile grid)
    N2, C2 = 100, 40
    x2 = jax.random.normal(k3, (N2, C2), dtype=jnp.float32)
    t2 = jax.nn.softmax(jax.random.normal(k4, (N2, C2), dtype=jnp.float32), axis=1)

    got_red2 = jax.block_until_ready(soft_cross_entropy(x2, t2, reduce=True))
    got_vec2 = jax.block_until_ready(soft_cross_entropy(x2, t2, reduce=False))
    assert got_vec2.shape == (N2,)
    assert jnp.allclose(got_vec2, _reference(x2, t2, False), atol=1e-5, rtol=1e-5)
    assert jnp.allclose(got_red2, _reference(x2, t2, True), atol=1e-5, rtol=1e-5)

    print("KERNEL_OK")
</pallas_src>

<mosaic_0001>
module attributes {stable_mosaic.version = 11 : i64} {
  func.func @_partial_sum_kernel(%arg0: i32, %arg1: memref<8x32xf32, #tpu.memory_space<vmem>>, %arg2: memref<8x32xf32, #tpu.memory_space<vmem>>, %arg3: memref<1x8x128xf32, #tpu.memory_space<vmem>>) attributes {dimension_semantics = [#tpu.dimension_semantics<parallel>], iteration_bounds = array<i64: 1>, scalar_prefetch = 0 : i64, scratch_operands = 0 : i64, tpu.core_type = #tpu.core_type<tc>, window_params = [{transform_indices = @transform_0, window_bounds = array<i64: 8, 32>}, {transform_indices = @transform_1, window_bounds = array<i64: 8, 32>}, {transform_indices = @transform_2, window_bounds = array<i64: 1, 8, 128>}]} {
    %c0 = arith.constant 0 : index
    %c0_0 = arith.constant 0 : index
    %0 = vector.load %arg1[%c0, %c0_0] : memref<8x32xf32, #tpu.memory_space<vmem>>, vector<8x32xf32>
    %c0_1 = arith.constant 0 : index
    %c0_2 = arith.constant 0 : index
    %1 = vector.load %arg2[%c0_1, %c0_2] : memref<8x32xf32, #tpu.memory_space<vmem>>, vector<8x32xf32>
    %cst = arith.constant dense<0xFF800000> : vector<8xf32>
    %2 = vector.multi_reduction <maximumf>, %0, %cst [1] : vector<8x32xf32> to vector<8xf32>
    %3 = vector.shape_cast %2 : vector<8xf32> to vector<8x1xf32>
    %4 = vector.broadcast %3 : vector<8x1xf32> to vector<8x32xf32>
    %5 = arith.subf %0, %4 : vector<8x32xf32>
    %6 = math.exp %5 : vector<8x32xf32>
    %cst_3 = arith.constant dense<0.000000e+00> : vector<8xf32>
    %7 = vector.multi_reduction <add>, %6, %cst_3 [1] : vector<8x32xf32> to vector<8xf32>
    %8 = vector.shape_cast %7 : vector<8xf32> to vector<8x1xf32>
    %9 = math.log %8 : vector<8x1xf32>
    %cst_4 = arith.constant dense<0.000000e+00> : vector<8xf32>
    %10 = vector.multi_reduction <add>, %1, %cst_4 [1] : vector<8x32xf32> to vector<8xf32>
    %11 = vector.shape_cast %10 : vector<8xf32> to vector<8x1xf32>
    %12 = arith.mulf %1, %5 : vector<8x32xf32>
    %cst_5 = arith.constant dense<0.000000e+00> : vector<8xf32>
    %13 = vector.multi_reduction <add>, %12, %cst_5 [1] : vector<8x32xf32> to vector<8xf32>
    %14 = vector.shape_cast %13 : vector<8xf32> to vector<8x1xf32>
    %15 = arith.mulf %9, %11 : vector<8x1xf32>
    %16 = arith.subf %15, %14 : vector<8x1xf32>
    %cst_6 = arith.constant dense<0.000000e+00> : vector<1xf32>
    %17 = vector.multi_reduction <add>, %16, %cst_6 [0] : vector<8x1xf32> to vector<1xf32>
    %18 = vector.shape_cast %17 : vector<1xf32> to vector<1x1xf32>
    %19 = vector.shape_cast %18 : vector<1x1xf32> to vector<1x1x1xf32>
    %20 = vector.shape_cast %19 : vector<1x1x1xf32> to vector<1x1x1xf32>
    %21 = vector.broadcast %20 : vector<1x1x1xf32> to vector<1x8x128xf32>
    %c0_7 = arith.constant 0 : index
    %c0_8 = arith.constant 0 : index
    %c0_9 = arith.constant 0 : index
    %22 = vector.load %arg3[%c0_7, %c0_8, %c0_9] : memref<1x8x128xf32, #tpu.memory_space<vmem>>, vector<1x8x128xf32>
    tpu.vector_store %arg3[%c0_7, %c0_8, %c0_9], %21 {strides = array<i32>} : memref<1x8x128xf32, #tpu.memory_space<vmem>>, vector<1x8x128xf32>,
    return
  }
  func.func @transform_0(%arg0: i32) -> (i32, i32) {
    %c0_i32 = arith.constant 0 : i32
    %c0_i32_0 = arith.constant 0 : i32
    return %arg0, %c0_i32 : i32, i32
  }
  func.func @transform_1(%arg0: i32) -> (i32, i32) {
    %c0_i32 = arith.constant 0 : i32
    %c0_i32_0 = arith.constant 0 : i32
    return %arg0, %c0_i32 : i32, i32
  }
  func.func @transform_2(%arg0: i32) -> (i32, i32, i32) {
    %c0_i32 = arith.constant 0 : i32
    %c0_i32_0 = arith.constant 0 : i32
    %c0_i32_1 = arith.constant 0 : i32
    return %arg0, %c0_i32, %c0_i32_0 : i32, i32, i32
  }
}

</mosaic_0001>

<bundles_post_ra>
// kernel: tpu_custom_call.1
= control target key start
LH: loop header
LB: loop body
LE: loop exit
PB: predicated region body
PF: predicated region fallthrough
CT: control target
= control target key end

     0   :  { %7 = vsyncpa [#allocation3], 0  ;;  %s215_s0 = inlined_call_operand.hbm [shape: f32[8,32], index: 0, kind: input, shape index: {}]   ;;  %s216_s1 = inlined_call_operand.hbm [shape: f32[8,32], index: 1, kind: input, shape index: {}]   ;;  %s217_s2 = inlined_call_operand.hbm [shape: f32[1,8,128], index: 2, kind: output, shape index: {}]  }
   0x1   :  { %8 = vsyncpa [#allocation6], 0 }
   0x2   :  { %9 = vsyncpa [#allocation4], 0  ;;  %s161_s9 = smov [#allocation2]   ;;  %s162_s11 = smov [#allocation5]  }
   0x3   :  { %s16_s10 = sshll.u32 %s161_s9, 4  ;;  %s26_s12 = sshll.u32 %s162_s11, 4  ;;  %s17_s10 = int_to_ptr.vmem [resolvable:$true] %s16_s10  ;;  %s27_s12 = int_to_ptr.vmem [resolvable:$true] %s26_s12 }
   0x4   :  { %s89_s15 = scalar_lea.hbm %s215_s0, 128 }
   0x5   :  { %p90_p0 = scmp.ne.s32.totalorder %s215_s0, %s89_s15  ;;  %p93_p1 = scmp.lt.u32.totalorder %s89_s15, %s215_s0 }
   0x7   :  { %p95_p2 = pnand %p93_p1, %p90_p0 }
   0x9   :  { %98 = shalt.err (!%p95_p2)
}
   0xa   :  { %s99_s20 = scalar_lea.vmem %s17_s10, 128  ;;  %p104_p4 = scmp.lt.s32.totalorder %s17_s10, %s17_s10 }
   0xb   :  { %p100_p3 = scmp.ne.s32.totalorder %s17_s10, %s99_s20  ;;  %p105_p5 = scmp.lt.s32.totalorder %s99_s20, %s99_s20 }
   0xd   :  { %p106_p6 = por %p105_p5, %p104_p4 }
   0xf   :  { %p107_p7 = pnand %p106_p6, %p100_p3 }
  0x11   :  { %110 = shalt.err (!%p107_p7)
}
  0x12   :  { %19 = dma.hbm_to_vmem [thread:$0]  %s215_s0, 128, %s17_s10, [#allocation3]  }
  0x13   :  { %s111_s25 = scalar_lea.hbm %s216_s1, 128 }
  0x14   :  { %p112_p8 = scmp.ne.s32.totalorder %s216_s1, %s111_s25  ;;  %p115_p9 = scmp.lt.u32.totalorder %s111_s25, %s216_s1 }
  0x16   :  { %p117_p10 = pnand %p115_p9, %p112_p8 }
  0x18   :  { %120 = shalt.err (!%p117_p10)
}
  0x19   :  { %s121_s30 = scalar_lea.vmem %s27_s12, 128  ;;  %p126_p12 = scmp.lt.s32.totalorder %s27_s12, %s27_s12 }
  0x1a   :  { %p122_p11 = scmp.ne.s32.totalorder %s27_s12, %s121_s30  ;;  %p127_p13 = scmp.lt.s32.totalorder %s121_s30, %s121_s30 }
  0x1c   :  { %p128_p0 = por %p127_p13, %p126_p12 }
  0x1e   :  { %p129_p1 = pnand %p128_p0, %p122_p11 }
  0x20   :  { %132 = shalt.err (!%p129_p1)
}
  0x21   :  { %29 = dma.hbm_to_vmem [thread:$0]  %s216_s1, 128, %s27_s12, [#allocation6]  }
  0x22   :  { %155 = dma.done.wait [#allocation3], 128  }
  0x23   :  { %156 = vsyncadd [#allocation3], 4294967168 }
  0x24   :  { %157 = dma.done.wait [#allocation6], 128  }
  0x25   :  { %158 = vsyncadd [#allocation6], 4294967168  ;;  %vm38_vm0 = vcmask 261120   ;;  %v36_v0 = vld [vmem:[#allocation2] sm:$0xff]  ;;  %v37_v2 = vld [vmem:[#allocation5] sm:$0xff]  ;;  %s163_s1 = smov [#allocation7]  }
  0x26   :  { %v39_v1 = vsel %vm38_vm0, %v36_v0, -inf  ;;  %v50_v3 = vsel %vm38_vm0, %v37_v2, 0.0  ;;  %s72_s4 = sshll.u32 %s163_s1, 4  ;;  %s73_s4 = int_to_ptr.vmem [resolvable:$true] %s72_s4 }
  0x27   :  { %40 = vmax.xlane.f32.xlu0 %v39_v1  ;;  %51 = vadd.xlane.f32.xlu1 %v50_v3  ;;  %s133_s5 = scalar_lea.vmem %s73_s4, 128  ;;  %p138_p3 = scmp.lt.s32.totalorder %s73_s4, %s73_s4 }
  0x28   :  { %p134_p2 = scmp.ne.s32.totalorder %s73_s4, %s133_s5  ;;  %p139_p4 = scmp.lt.s32.totalorder %s133_s5, %s133_s5 }
  0x2a   :  { %p140_p5 = por %p139_p4, %p138_p3 }
  0x2c   :  { %p141_p6 = pnand %p140_p5, %p134_p2 }
  0xb4   :  { %v41_v4 = vpop.xlane.xlu0 %40  ;;  %v52_v12 = vpop.xlane.xlu1 %51 }
  0xb5   :  { %v42_v5 = vsub.f32 %v36_v0, %v41_v4 }
  0xb7   :  { %v43_v6 = vmul.f32 1.442695, %v42_v5  ;;  %v53_v7 = vmul.f32 %v42_v5, %v37_v2 }
  0xb9   :  { %85 = vpow2.f32 %v43_v6  ;;  %v54_v8 = vsel %vm38_vm0, %v53_v7, 0.0 }
  0xba   :  { %55 = vadd.xlane.f32.xlu1 %v54_v8 }
  0xc3   :  { %v86_v9 = vpop.eup %85 }
  0xc4   :  { %v45_v10 = vsel %vm38_vm0, %v86_v9, 0.0 }
  0xc5   :  { %46 = vadd.xlane.f32.xlu0 %v45_v10 }
 0x147   :  { %v56_v16 = vpop.xlane.xlu1 %55 }
 0x152   :  { %v47_v11 = vpop.xlane.xlu0 %46 }
 0x153   :  { %87 = vlog2.f32 %v47_v11 }
 0x15d   :  { %v88_v13 = vpop.eup %87 }
 0x15e   :  { %v49_v14 = vmul.f32 0.6931472, %v88_v13 }
 0x160   :  { %v57_v15 = vmul.f32 %v52_v12, %v49_v14 }
 0x162   :  { %v58_v17 = vsub.f32 %v57_v15, %v56_v16 }
 0x164   :  { %v59_v18 = vrot.slane %v58_v17, 4 }
 0x166   :  { %v60_v19 = vadd.f32 %v59_v18, %v58_v17 }
 0x168   :  { %v61_v20 = vrot.slane %v60_v19, 2 }
 0x16a   :  { %v62_v21 = vadd.f32 %v61_v20, %v60_v19 }
 0x16c   :  { %v63_v22 = vrot.slane %v62_v21, 1 }
 0x16e   :  { %v64_v23 = vadd.f32 %v63_v22, %v62_v21 }
 0x170   :  { %65 = vst [vmem:[#allocation7] sm:$0xff] %v64_v23 }
 0x171   :  { %144 = shalt.err (!%p141_p6)
}
 0x172   :  { %s145_s8 = scalar_lea.hbm %s217_s2, 128 }
 0x173   :  { %p146_p7 = scmp.ne.s32.totalorder %s217_s2, %s145_s8  ;;  %p149_p8 = scmp.lt.u32.totalorder %s145_s8, %s217_s2 }
 0x175   :  { %p151_p9 = pnand %p149_p8, %p146_p7 }
 0x177   :  { %154 = shalt.err (!%p151_p9)
}
 0x178   :  { %75 = dma.vmem_to_hbm [thread:$0]  %s73_s4, 128, %s217_s2, [#allocation4]  }
 0x179   :  { %159 = dma.done.wait [#allocation4], 128  }
 0x17a   :  { %160 = vsyncadd [#allocation4], 4294967168 }
 0x17b   :  { %79 = vsyncpa [#allocation3], 1 }
 0x17c   :  { %80 = vsyncpa [#allocation6], 1 }
 0x17d   :  { %81 = vsyncpa [#allocation4], 1 }

</bundles_post_ra>
